<compile_context>
chip_gen: v6e
topology: v6e:2x2x1
jax: 0.10.0
libtpu: 0.0.40
codegen_flags: <defaults>
</compile_context>

<pallas_src>
import jax
import jax.numpy as jnp
from jax.experimental import pallas as pl
from jax.experimental.pallas import tpu as pltpu


def critic_kernel(x_ref, w1t_ref, b1_ref, w2t_ref, b2_ref, wv_ref, bv_ref, out_ref):
    x = x_ref[...]                                        # (TB, obs_dim), batch on sublanes
    # Layer 1, computed transposed: h = tanh(W1^T @ x^T + b1) of shape (h1, TB).
    # NT-form dot_general (contract the last dims of both operands) puts the batch
    # on the lane axis without any explicit transpose.
    h = jax.lax.dot_general(
        w1t_ref[...], x,
        dimension_numbers=(((1,), (1,)), ((), ())),
        preferred_element_type=jnp.float32,
    )
    h = jnp.tanh(h + b1_ref[...])                         # (h1, TB); (h1,1) bias lane-broadcast
    # Layer 2: standard MXU matmul, stays in (features, batch) orientation.
    h = jnp.dot(w2t_ref[...], h, preferred_element_type=jnp.float32)
    h = jnp.tanh(h + b2_ref[...])                         # (h2, TB)
    # Value head: VPU multiply + sublane (cross-feature) reduction instead of an
    # N=1 MXU matmul -> result is already lane-dense (1, TB).
    v = jnp.sum(h * wv_ref[...], axis=0, keepdims=True) + bv_ref[0, 0]
    out_ref[...] = v                                      # (1, TB), unmasked stores


def _round_up(x, m):
    return (x + m - 1) // m * m


def critic_forward(obs, params, *, block_b=512):
    """obs: (B, obs_dim) float32. Returns (values (B,), states=None)."""
    w1t, b1, w2t, b2, wv, bv = params
    B, obs_dim = obs.shape
    h1 = w1t.shape[0]
    h2 = w2t.shape[0]

    assert block_b % 128 == 0, "block_b must be a multiple of 128 (lane width)"
    if B <= block_b:
        tb = _round_up(B, 8)          # single tile, sublane-aligned
    else:
        tb = block_b                  # multi-tile: lane-dense output blocks (mult. of 128)
    b_pad = _round_up(B, tb)
    if b_pad != B:
        obs = jnp.pad(obs, ((0, b_pad - B), (0, 0)))
    grid = (b_pad // tb,)

    param_bytes = 4 * (w1t.size + b1.size + w2t.size + b2.size + wv.size + bv.size)
    cost = pl.CostEstimate(
        flops=2 * b_pad * (obs_dim * h1 + h1 * h2 + h2),
        transcendentals=b_pad * (h1 + h2),
        bytes_accessed=4 * (b_pad * obs_dim + b_pad) + param_bytes,
    )

    out = pl.pallas_call(
        critic_kernel,
        out_shape=jax.ShapeDtypeStruct((1, b_pad), jnp.float32),
        grid=grid,
        in_specs=[
            pl.BlockSpec((tb, obs_dim), lambda i: (i, 0)),      # obs tile (streamed)
            pl.BlockSpec((h1, obs_dim), lambda i: (0, 0)),      # W1^T, resident
            pl.BlockSpec((h1, 1), lambda i: (0, 0)),            # b1 column, resident
            pl.BlockSpec((h2, h1), lambda i: (0, 0)),           # W2^T, resident
            pl.BlockSpec((h2, 1), lambda i: (0, 0)),            # b2 column, resident
            pl.BlockSpec((h2, 1), lambda i: (0, 0)),            # value-head weights
            pl.BlockSpec(memory_space=pltpu.MemorySpace.SMEM),  # value-head bias scalar
        ],
        out_specs=pl.BlockSpec((1, tb), lambda i: (0, i)),      # lane-dense output block
        compiler_params=pltpu.CompilerParams(
            dimension_semantics=("parallel",),                  # v7x dual-TC sharding
            vmem_limit_bytes=32 * 1024 * 1024,
        ),
        cost_estimate=cost,
    )(obs, w1t, b1, w2t, b2, wv, bv)

    values = out[0, :B]               # undo padding; .squeeze(-1) equivalent
    states = None                     # rnn=None branch
    return values, states


def init_params(key, obs_dim, hidden_sizes):
    """Deterministic synthetic params, stored in the kernel's transposed layout:
    weights as (out_features, in_features), biases as (out_features, 1) columns."""
    h1, h2 = hidden_sizes
    ks = jax.random.split(key, 6)
    w1t = jax.random.normal(ks[0], (h1, obs_dim), jnp.float32) / jnp.sqrt(obs_dim)
    b1 = 0.1 * jax.random.normal(ks[1], (h1, 1), jnp.float32)
    w2t = jax.random.normal(ks[2], (h2, h1), jnp.float32) / jnp.sqrt(h1)
    b2 = 0.1 * jax.random.normal(ks[3], (h2, 1), jnp.float32)
    wv = jax.random.normal(ks[4], (h2, 1), jnp.float32) / jnp.sqrt(h2)
    bv = 0.1 * jax.random.normal(ks[5], (1, 1), jnp.float32)
    return (w1t, b1, w2t, b2, wv, bv)


def reference_forward(obs, params):
    """Pure-JAX reference (natural batch-major orientation)."""
    w1t, b1, w2t, b2, wv, bv = params
    h = jnp.tanh(obs @ w1t.T + b1[:, 0])
    h = jnp.tanh(h @ w2t.T + b2[:, 0])
    v = jnp.sum(h * wv[:, 0], axis=-1) + bv[0, 0]
    return v


if __name__ == "__main__":
    key = jax.random.PRNGKey(0)
    k_obs, k_obs2, k_par = jax.random.split(key, 3)

    OBS_DIM = 16
    HIDDEN_SIZES = [32, 32]
    params = init_params(k_par, OBS_DIM, HIDDEN_SIZES)

    # Small single-tile case (grid == 1).
    B = 8
    obs = jax.random.normal(k_obs, (B, OBS_DIM), jnp.float32)
    values, states = critic_forward(obs, params)
    values = jax.block_until_ready(values)
    ref = reference_forward(obs, params)
    assert values.shape == (B,)
    assert states is None
    assert jnp.allclose(values, ref, atol=1e-4, rtol=1e-4), "mismatch vs reference (B=8)"

    # Larger batch exercising the tiled / pipelined path (grid > 1, ragged tail).
    B2 = 613
    obs2 = jax.random.normal(k_obs2, (B2, OBS_DIM), jnp.float32)
    values2, _ = critic_forward(obs2, params)
    values2 = jax.block_until_ready(values2)
    ref2 = reference_forward(obs2, params)
    assert values2.shape == (B2,)
    assert jnp.allclose(values2, ref2, atol=1e-4, rtol=1e-4), "mismatch vs reference (B=613)"

    print("KERNEL_OK")
</pallas_src>

<mosaic_0001>
module attributes {stable_mosaic.version = 11 : i64} {
  func.func @critic_kernel(%arg0: i32, %arg1: memref<8x16xf32, #tpu.memory_space<vmem>>, %arg2: memref<32x16xf32, #tpu.memory_space<vmem>>, %arg3: memref<32x1xf32, #tpu.memory_space<vmem>>, %arg4: memref<32x32xf32, #tpu.memory_space<vmem>>, %arg5: memref<32x1xf32, #tpu.memory_space<vmem>>, %arg6: memref<32x1xf32, #tpu.memory_space<vmem>>, %arg7: memref<1x1xf32, #tpu.memory_space<smem>>, %arg8: memref<1x8xf32, #tpu.memory_space<vmem>>) attributes {dimension_semantics = [#tpu.dimension_semantics<parallel>], iteration_bounds = array<i64: 1>, scalar_prefetch = 0 : i64, scratch_operands = 0 : i64, tpu.core_type = #tpu.core_type<tc>, window_params = [{transform_indices = @transform_0, window_bounds = array<i64: 8, 16>}, {pipeline_mode = #tpu.pipeline_mode<synchronous>, transform_indices = @transform_1, window_bounds = array<i64: 32, 16>}, {pipeline_mode = #tpu.pipeline_mode<synchronous>, transform_indices = @transform_2, window_bounds = array<i64: 32, 1>}, {pipeline_mode = #tpu.pipeline_mode<synchronous>, transform_indices = @transform_3, window_bounds = array<i64: 32, 32>}, {pipeline_mode = #tpu.pipeline_mode<synchronous>, transform_indices = @transform_4, window_bounds = array<i64: 32, 1>}, {pipeline_mode = #tpu.pipeline_mode<synchronous>, transform_indices = @transform_5, window_bounds = array<i64: 32, 1>}, {transform_indices = @transform_6, window_bounds = array<i64: 1, 1>}, {transform_indices = @transform_7, window_bounds = array<i64: 1, 8>}]} {
    %c0 = arith.constant 0 : index
    %c0_0 = arith.constant 0 : index
    %0 = vector.load %arg1[%c0, %c0_0] : memref<8x16xf32, #tpu.memory_space<vmem>>, vector<8x16xf32>
    %c0_1 = arith.constant 0 : index
    %c0_2 = arith.constant 0 : index
    %1 = vector.load %arg2[%c0_1, %c0_2] : memref<32x16xf32, #tpu.memory_space<vmem>>, vector<32x16xf32>
    %cst = arith.constant dense<0.000000e+00> : vector<32x8xf32>
    %2 = tpu.matmul %1, %0, %cst {dimension_numbers = #tpu.dot_dimension_numbers<[1], [1], [0], [0], [0, 0, 1, 0], [], []>} : vector<32x16xf32>, vector<8x16xf32>, vector<32x8xf32> -> vector<32x8xf32>
    %c0_3 = arith.constant 0 : index
    %c0_4 = arith.constant 0 : index
    %3 = vector.load %arg3[%c0_3, %c0_4] : memref<32x1xf32, #tpu.memory_space<vmem>>, vector<32x1xf32>
    %4 = vector.broadcast %3 : vector<32x1xf32> to vector<32x8xf32>
    %5 = arith.addf %2, %4 : vector<32x8xf32>
    %6 = math.tanh %5 : vector<32x8xf32>
    %c0_5 = arith.constant 0 : index
    %c0_6 = arith.constant 0 : index
    %7 = vector.load %arg4[%c0_5, %c0_6] : memref<32x32xf32, #tpu.memory_space<vmem>>, vector<32x32xf32>
    %cst_7 = arith.constant dense<0.000000e+00> : vector<32x8xf32>
    %8 = tpu.matmul %7, %6, %cst_7 {dimension_numbers = #tpu.dot_dimension_numbers<[1], [0], [0], [1], [0, 0, 1, 1], [], []>} : vector<32x32xf32>, vector<32x8xf32>, vector<32x8xf32> -> vector<32x8xf32>
    %c0_8 = arith.constant 0 : index
    %c0_9 = arith.constant 0 : index
    %9 = vector.load %arg5[%c0_8, %c0_9] : memref<32x1xf32, #tpu.memory_space<vmem>>, vector<32x1xf32>
    %10 = vector.broadcast %9 : vector<32x1xf32> to vector<32x8xf32>
    %11 = arith.addf %8, %10 : vector<32x8xf32>
    %12 = math.tanh %11 : vector<32x8xf32>
    %c0_10 = arith.constant 0 : index
    %c0_11 = arith.constant 0 : index
    %13 = vector.load %arg6[%c0_10, %c0_11] : memref<32x1xf32, #tpu.memory_space<vmem>>, vector<32x1xf32>
    %14 = vector.broadcast %13 : vector<32x1xf32> to vector<32x8xf32>
    %15 = arith.mulf %12, %14 : vector<32x8xf32>
    %cst_12 = arith.constant dense<0.000000e+00> : vector<8xf32>
    %16 = vector.multi_reduction <add>, %15, %cst_12 [0] : vector<32x8xf32> to vector<8xf32>
    %17 = vector.shape_cast %16 : vector<8xf32> to vector<1x8xf32>
    %c0_13 = arith.constant 0 : index
    %c0_14 = arith.constant 0 : index
    %18 = memref.load %arg7[%c0_13, %c0_14] : memref<1x1xf32, #tpu.memory_space<smem>>
    %19 = vector.broadcast %18 : f32 to vector<1x8xf32>
    %20 = arith.addf %17, %19 : vector<1x8xf32>
    %c0_15 = arith.constant 0 : index
    %c0_16 = arith.constant 0 : index
    %21 = vector.load %arg8[%c0_15, %c0_16] : memref<1x8xf32, #tpu.memory_space<vmem>>, vector<1x8xf32>
    tpu.vector_store %arg8[%c0_15, %c0_16], %20 {strides = array<i32>} : memref<1x8xf32, #tpu.memory_space<vmem>>, vector<1x8xf32>,
    return
  }
  func.func @transform_0(%arg0: i32) -> (i32, i32) {
    %c0_i32 = arith.constant 0 : i32
    %c0_i32_0 = arith.constant 0 : i32
    return %arg0, %c0_i32 : i32, i32
  }
  func.func @transform_1(%arg0: i32) -> (i32, i32) {
    %c0_i32 = arith.constant 0 : i32
    %c0_i32_0 = arith.constant 0 : i32
    %c0_i32_1 = arith.constant 0 : i32
    return %c0_i32, %c0_i32_0 : i32, i32
  }
  func.func @transform_2(%arg0: i32) -> (i32, i32) {
    %c0_i32 = arith.constant 0 : i32
    %c0_i32_0 = arith.constant 0 : i32
    %c0_i32_1 = arith.constant 0 : i32
    return %c0_i32, %c0_i32_0 : i32, i32
  }
  func.func @transform_3(%arg0: i32) -> (i32, i32) {
    %c0_i32 = arith.constant 0 : i32
    %c0_i32_0 = arith.constant 0 : i32
    %c0_i32_1 = arith.constant 0 : i32
    return %c0_i32, %c0_i32_0 : i32, i32
  }
  func.func @transform_4(%arg0: i32) -> (i32, i32) {
    %c0_i32 = arith.constant 0 : i32
    %c0_i32_0 = arith.constant 0 : i32
    %c0_i32_1 = arith.constant 0 : i32
    return %c0_i32, %c0_i32_0 : i32, i32
  }
  func.func @transform_5(%arg0: i32) -> (i32, i32) {
    %c0_i32 = arith.constant 0 : i32
    %c0_i32_0 = arith.constant 0 : i32
    %c0_i32_1 = arith.constant 0 : i32
    return %c0_i32, %c0_i32_0 : i32, i32
  }
  func.func @transform_6(%arg0: i32) -> (i32, i32) {
    %c0_i32 = arith.constant 0 : i32
    %c0_i32_0 = arith.constant 0 : i32
    %c0_i32_1 = arith.constant 0 : i32
    return %c0_i32, %c0_i32_0 : i32, i32
  }
  func.func @transform_7(%arg0: i32) -> (i32, i32) {
    %c0_i32 = arith.constant 0 : i32
    %c0_i32_0 = arith.constant 0 : i32
    return %c0_i32, %arg0 : i32, i32
  }
}

</mosaic_0001>

<bundles_post_ra>
// kernel: tpu_custom_call.1
= control target key start
LH: loop header
LB: loop body
LE: loop exit
PB: predicated region body
PF: predicated region fallthrough
CT: control target
= control target key end

     0   :  { %vm57_vm0 = vcmask 130048   ;;  %v439_v4 = vmov 0   ;;  %s560_s0 = inlined_call_operand.vmem [shape: f32[8,16], index: 0, kind: input, shape index: {}]   ;;  %s561_s1 = inlined_call_operand.vmem [shape: f32[32,16], index: 1, kind: input, shape index: {}]   ;;  %s562_s2 = inlined_call_operand.vmem [shape: f32[32,1], index: 2, kind: input, shape index: {}]   ;;  %s563_s3 = inlined_call_operand.vmem [shape: f32[32,32], index: 3, kind: input, shape index: {}]   ;;  %s564_s4 = inlined_call_operand.vmem [shape: f32[32,1], index: 4, kind: input, shape index: {}]   ;;  %s565_s5 = inlined_call_operand.vmem [shape: f32[32,1], index: 5, kind: input, shape index: {}]   ;;  %s566_s6 = inlined_call_operand.<no memory space> [shape: f32[1,1], index: 6, kind: input, shape index: {}]   ;;  %s567_s7 = inlined_call_operand.hbm [shape: f32[1,8], index: 7, kind: output, shape index: {}]  }
   0x1   :  { %v28_v0 = vld [vmem:[%s560_s0] sm:$0xff]  ;;  %v36_v2 = vld [vmem:[%s562_s2 + $0x18] sm:$0xff]  ;;  %v30_v3 = vld [vmem:[%s561_s1 + $0x8] sm:$0xff]  ;;  %399 = vset.pattern.permute.xlu0 %v439_v4  ;;  %400 = vset.pattern.permute.xlu1 %v439_v4 }
   0x2   :  { %v29_v1 = vld [vmem:[%s561_s1] sm:$0xff]  ;;  %375 = vmatprep.subr.msk.mxu0 %vm57_vm0, %v28_v0  ;;  %v34_v5 = vld [vmem:[%s562_s2 + $0x8] sm:$0xff]  ;;  %v31_v6 = vld [vmem:[%s561_s1 + $0x10] sm:$0xff]  ;;  %54 = vperm.xlu0 %399, %v36_v2  }
   0x3   :  { %377 = vmatprep.mubr.msk.f32.mxu0 %vm57_vm0, %v29_v1  ;;  %376 = vmatpush3.xpose.msk.msra.mxu0 %vm57_vm0, %v28_v0  ;;  %v35_v7 = vld [vmem:[%s562_s2 + $0x10] sm:$0xff]  ;;  %v33_v8 = vld [vmem:[%s562_s2] sm:$0xff] }
   0x4   :  { %44 = vperm.xlu1 %400, %v34_v5  }
   0x6   :  { %378 = vmatmul.mubr.msk.f32.vlgmr.msra.gmra.mxu0 %vm57_vm0, %v30_v3 }
   0x7   :  { %13 = vsyncpa [#allocation4], 0  ;;  %380 = vmatprep.mubr.msk.f32.mxu0 %vm57_vm0, %v31_v6  ;;  %v32_v9 = vld [vmem:[%s561_s1 + $0x18] sm:$0xff]  ;;  %49 = vperm.xlu0 %399, %v35_v7   ;;  %v166_v10 = vld [vmem:[%s564_s4] sm:$0xff]  ;;  %vm190_vm1 = vcmask 261120   ;;  %vm320_vm2 = vcmask 64512  }
   0x8   :  { %39 = vperm.xlu1 %400, %v33_v8   ;;  %v167_v11 = vld [vmem:[%s564_s4 + $0x8] sm:$0xff]  ;;  %v168_v12 = vld [vmem:[%s564_s4 + $0x10] sm:$0xff]  ;;  %v169_v13 = vld [vmem:[%s564_s4 + $0x18] sm:$0xff]  ;;  %s440_s15 = smov [#allocation3]   ;;  %vm337_vm3 = vcmask 57344  }
   0x9   :  { %v292_v14 = vld [vmem:[%s565_s5] sm:$0xff]  ;;  %v293_v15 = vld [vmem:[%s565_s5 + $0x8] sm:$0xff]  ;;  %v294_v16 = vld [vmem:[%s565_s5 + $0x10] sm:$0xff]  ;;  %s345_s16 = sshll.u32 %s440_s15, 4  ;;  %s346_s16 = int_to_ptr.vmem [resolvable:$true] %s345_s16 }
   0xa   :  { %381 = vmatmul.mubr.msk.f32.gmra.mxu0 %vm57_vm0, %v32_v9  ;;  %v295_v17 = vld [vmem:[%s565_s5 + $0x18] sm:$0xff]  ;;  %v162_v18 = vld [vmem:[%s563_s3] sm:$0xff]  ;;  %v163_v35 = vld [vmem:[%s563_s3 + $0x8] sm:$0xff]  ;;  %s417_s17 = scalar_lea.vmem %s346_s16, 16  ;;  %s421_s18 = scalar_lea.vmem %s346_s16, 32 }
   0xb   :  { %172 = vperm.xlu0 %399, %v166_v10   ;;  %391 = vmatprep.mubr.msk.f32.mxu1 %vm190_vm1, %v162_v18  ;;  %v164_v36 = vld [vmem:[%s563_s3 + $0x10] sm:$0xff]  ;;  %v165_v37 = vld [vmem:[%s563_s3 + $0x18] sm:$0xff]  ;;  %v335_v10 = vstv %s566_s6  ;;  %p418_p0 = scmp.ne.s32.totalorder %s346_s16, %s417_s17  ;;  %p422_p1 = scmp.lt.s32.totalorder %s346_s16, %s346_s16 }
   0xc   :  { %177 = vperm.xlu1 %400, %v167_v11   ;;  %p423_p2 = scmp.lt.s32.totalorder %s421_s18, %s417_s17 }
   0xe   :  { %p424_p3 = por %p423_p2, %p422_p1 }
   0xf   :  { %182 = vperm.xlu0 %399, %v168_v12  }
  0x10   :  { %187 = vperm.xlu1 %400, %v169_v13   ;;  %p425_p4 = pnand %p424_p3, %p418_p0 }
  0x13   :  { %298 = vperm.xlu0 %399, %v292_v14  }
  0x14   :  { %303 = vperm.xlu1 %400, %v293_v15  }
  0x17   :  { %308 = vperm.xlu0 %399, %v294_v16  }
  0x18   :  { %313 = vperm.xlu1 %400, %v295_v17  }
  0x7d   :  { %v55_v19 = vpop.permute.xlu0 %54 }
  0x7f   :  { %v45_v21 = vpop.permute.xlu1 %44 }
  0x82   :  { %v50_v25 = vpop.permute.xlu0 %49 }
  0x83   :  { %v40_v29 = vpop.permute.xlu1 %39 }
  0x86   :  { %v173_v39 = vpop.permute.xlu0 %172 }
  0x87   :  { %v178_v38 = vpop.permute.xlu1 %177 }
  0x8a   :  { %v183_v47 = vpop.permute.xlu0 %182 }
  0x8b   :  { %v188_v44 = vpop.permute.xlu1 %187 }
  0x8e   :  { %v299_v51 = vpop.permute.xlu0 %298 }
  0x8f   :  { %v304_v52 = vpop.permute.xlu1 %303 }
  0x92   :  { %v309_v59 = vpop.permute.xlu0 %308 }
  0x93   :  { %v314_v60 = vpop.permute.xlu1 %313 }
  0xc6   :  { %v379_v20 = vpop.f32.mrf.mxu0 }
  0xc7   :  { %v145_v27 = vadd.f32 %v379_v20, %v45_v21 }
  0xc8   :  { %v139_v22 = vpop.f32.mrf.mxu0 }
  0xc9   :  { %v140_v30 = vadd.f32 %v139_v22, %v40_v29 }
  0xca   :  { %v382_v23 = vpop.f32.mrf.mxu0 }
  0xcb   :  { %v155_v24 = vadd.f32 %v382_v23, %v55_v19 }
  0xcc   :  { %v149_v26 = vpop.f32.mrf.mxu0 }
  0xcd   :  { %401 = vtanh.f32 %v155_v24  ;;  %v150_v28 = vadd.f32 %v149_v26, %v50_v25 }
  0xcf   :  { %403 = vtanh.f32 %v150_v28 }
  0xd0   :  { %405 = vtanh.f32 %v145_v27 }
  0xd1   :  { %407 = vtanh.f32 %v140_v30 }
  0xda   :  { %v402_v31 = vpop.eup %401 }
  0xdb   :  { %383 = vmatprep.subr.mxu1 %v402_v31 }
  0xdc   :  { %v404_v32 = vpop.eup %403  ;;  %384 = vmatpush3.msra.mxu1 %v402_v31 }
  0xdd   :  { %385 = vmatprep.subr.mxu1 %v404_v32  ;;  %v406_v33 = vpop.eup %405 }
  0xde   :  { %386 = vmatpush3.msra.mxu1 %v404_v32  ;;  %v408_v34 = vpop.eup %407 }
  0xdf   :  { %387 = vmatprep.subr.mxu1 %v406_v33 }
  0xe0   :  { %388 = vmatpush3.msra.mxu1 %v406_v33 }
  0xe1   :  { %389 = vmatprep.subr.mxu1 %v408_v34 }
  0xe2   :  { %390 = vmatpush3.msra.mxu1 %v408_v34 }
  0xe3   :  { %392 = vmatmul.mubr.msk.f32.vlgmr.msra.gmra.mxu1 %vm190_vm1, %v163_v35 }
  0xe4   :  { %394 = vmatprep.mubr.msk.f32.mxu1 %vm190_vm1, %v164_v36 }
  0xe7   :  { %395 = vmatmul.mubr.msk.f32.gmra.mxu1 %vm190_vm1, %v165_v37 }
 0x1a3   :  { %v393_v40 = vpop.f32.mrf.mxu1 }
 0x1a4   :  { %v275_v41 = vadd.f32 %v393_v40, %v178_v38 }
 0x1a5   :  { %v269_v42 = vpop.f32.mrf.mxu1 }
 0x1a6   :  { %409 = vtanh.f32 %v275_v41  ;;  %v270_v43 = vadd.f32 %v269_v42, %v173_v39 }
 0x1a7   :  { %v396_v45 = vpop.f32.mrf.mxu1 }
 0x1a8   :  { %411 = vtanh.f32 %v270_v43  ;;  %v285_v46 = vadd.f32 %v396_v45, %v188_v44 }
 0x1a9   :  { %v279_v48 = vpop.f32.mrf.mxu1 }
 0x1aa   :  { %413 = vtanh.f32 %v285_v46  ;;  %v280_v49 = vadd.f32 %v279_v48, %v183_v47 }
 0x1ac   :  { %415 = vtanh.f32 %v280_v49 }
 0x1b3   :  { %v410_v50 = vpop.eup %409 }
 0x1b4   :  { %v317_v54 = vmul.f32 %v410_v50, %v304_v52 }
 0x1b5   :  { %v412_v53 = vpop.eup %411 }
 0x1b6   :  { %v316_v55 = vmul.f32 %v412_v53, %v299_v51  ;;  %v322_v63 = vsel %vm320_vm2, %v317_v54, 0.0 }
 0x1b7   :  { %v414_v56 = vpop.eup %413 }
 0x1b8   :  { %v321_v57 = vsel %vm320_vm2, %v316_v55, 0.0  ;;  %v319_v62 = vmul.f32 %v414_v56, %v314_v60 }
 0x1b9   :  { %v416_v58 = vpop.eup %415  ;;  %v323_v0 = vadd.f32 %v322_v63, %v321_v57 }
 0x1ba   :  { %v318_v61 = vmul.f32 %v416_v58, %v309_v59  ;;  %v326_v3 = vsel %vm320_vm2, %v319_v62, 0.0 }
 0x1bc   :  { %v324_v1 = vsel %vm320_vm2, %v318_v61, 0.0 }
 0x1bd   :  { %v325_v2 = vadd.f32 %v324_v1, %v323_v0 }
 0x1bf   :  { %v327_v4 = vadd.f32 %v326_v3, %v325_v2 }
 0x1c1   :  { %v328_v5 = vrot.slane %v327_v4, 4 }
 0x1c3   :  { %v329_v6 = vadd.f32 %v328_v5, %v327_v4 }
 0x1c5   :  { %v330_v7 = vrot.slane %v329_v6, 2 }
 0x1c7   :  { %v331_v8 = vadd.f32 %v330_v7, %v329_v6 }
 0x1c9   :  { %v332_v9 = vrot.slane %v331_v8, 1 }
 0x1cb   :  { %v333_v11 = vadd.f32 %v332_v9, %v331_v8 }
 0x1cd   :  { %v336_v12 = vadd.f32 %v335_v10, %v333_v11 }
 0x1cf   :  { %338 = vst.msk [vmem:[#allocation3] sm:$0x1] %vm337_vm3, %v336_v12 }
 0x1d0   :  { %428 = shalt.err (!%p425_p4)
}
 0x1d1   :  { %348 = dma.vmem_to_hbm [thread:$0]  %s346_s16, 16, %s567_s7, [#allocation4]  }
 0x1d2   :  { %437 = dma.done.wait [#allocation4], 16  }
 0x1d3   :  { %438 = vsyncadd [#allocation4], 4294967280 }
 0x1d4   :  { %352 = vsyncpa [#allocation4], 1 }

</bundles_post_ra>
